<compile_context>
chip_gen: v5e
topology: v5e:2x2
jax: 0.10.0
libtpu: 0.0.40
codegen_flags: <defaults>
</compile_context>

<pallas_src>
import functools

import jax
import jax.numpy as jnp
from jax.experimental import pallas as pl
from jax.experimental.pallas import tpu as pltpu

LANE = 128


def _round_up(x, m):
    return ((x + m - 1) // m) * m


def _fused_sage_kernel(a_ref, xs_ref, xr_ref,
                       w1l_ref, w1r_ref, b1_ref,
                       w2l_ref, w2r_ref, b2_ref,
                       o_ref,
                       h_scr, acc1, acc2, *, t):
    p = pl.program_id(0)          # phase: 0 = layer 1, 1 = layer 2
    r = pl.program_id(1)          # target-row tile
    k = pl.program_id(2)          # source-node (reduction) tile
    nk = pl.num_programs(2)

    row0 = pl.multiple_of(r * t, t)
    col0 = pl.multiple_of(k * t, t)

    # ---------------- phase 0: layer 1 -> h (ReLU) into VMEM scratch ----------
    @pl.when(p == 0)
    def _phase0():
        @pl.when(k == 0)
        def _init1():
            # root/self term + bias, once per row tile, straight into f32 acc.
            acc1[...] = (
                jnp.dot(xr_ref[...], w1r_ref[...],
                        preferred_element_type=jnp.float32)
                + b1_ref[...]
            )
            # keep phase-0 output writebacks deterministic (overwritten in phase 1)
            o_ref[...] = jnp.zeros_like(o_ref)

        # reassociated aggregation: A[r,k] @ (X[k] @ W1_l)
        p1 = jnp.dot(xs_ref[...], w1l_ref[...],
                     preferred_element_type=jnp.float32).astype(jnp.bfloat16)
        acc1[...] += jnp.dot(a_ref[...], p1, preferred_element_type=jnp.float32)

        @pl.when(k == nk - 1)
        def _fin1():
            h_scr[pl.ds(row0, t), :] = jnp.maximum(acc1[...], 0.0).astype(h_scr.dtype)

    # ---------------- phase 1: layer 2 on VMEM-resident h ---------------------
    @pl.when(p == 1)
    def _phase1():
        @pl.when(k == 0)
        def _init2():
            h_r = h_scr[pl.ds(row0, t), :]
            acc2[...] = (
                jnp.dot(h_r, w2r_ref[...], preferred_element_type=jnp.float32)
                + b2_ref[...]
            )

        h_k = h_scr[pl.ds(col0, t), :]
        p2 = jnp.dot(h_k, w2l_ref[...],
                     preferred_element_type=jnp.float32).astype(jnp.bfloat16)
        acc2[...] += jnp.dot(a_ref[...], p2, preferred_element_type=jnp.float32)

        @pl.when(k == nk - 1)
        def _fin2():
            o_ref[...] = acc2[...].astype(o_ref.dtype)


def graphsage_forward(x, a_norm, params, *, tile=256):
    """Fused 2-layer GraphSAGE forward (eval mode) as a single Pallas call.

    a_norm: (N, N) dense row-normalized adjacency (precompute once per graph).
    """
    n, f_in = x.shape
    hidden = params["w1_l"].shape[1]
    f_out = params["w2_l"].shape[1]

    t = max(min(tile, _round_up(n, LANE)), LANE)   # (T, T) adjacency tile, lane aligned
    n_pad = _round_up(n, t)
    f_pad = _round_up(f_in, LANE)
    h_pad = _round_up(hidden, LANE)
    o_pad = _round_up(f_out, LANE)

    bf = jnp.bfloat16
    a_p = jnp.zeros((n_pad, n_pad), bf).at[:n, :n].set(a_norm.astype(bf))
    x_p = jnp.zeros((n_pad, f_pad), bf).at[:n, :f_in].set(x.astype(bf))
    w1l = jnp.zeros((f_pad, h_pad), bf).at[:f_in, :hidden].set(params["w1_l"].astype(bf))
    w1r = jnp.zeros((f_pad, h_pad), bf).at[:f_in, :hidden].set(params["w1_r"].astype(bf))
    b1 = jnp.zeros((1, h_pad), jnp.float32).at[:, :hidden].set(params["b1"])
    w2l = jnp.zeros((h_pad, o_pad), bf).at[:hidden, :f_out].set(params["w2_l"].astype(bf))
    w2r = jnp.zeros((h_pad, o_pad), bf).at[:hidden, :f_out].set(params["w2_r"].astype(bf))
    b2 = jnp.zeros((1, o_pad), jnp.float32).at[:, :f_out].set(params["b2"])

    n_tiles = n_pad // t
    grid = (2, n_tiles, n_tiles)   # (phase, row tile, K/source tile) — reduction last

    # Explicit VMEM budget (double-buffered inputs/outputs + scratch), clamped to
    # stay well inside v5e (16 MiB scoped default) / v6e (32) / v7x (64 physical).
    vmem_est = (
        2 * t * t * 2                                   # A tile (bf16) x2 buffers
        + 2 * 2 * t * f_pad * 2                         # X source + root tiles
        + 2 * 2 * (f_pad * h_pad + h_pad * o_pad) * 2   # weights
        + 2 * (h_pad + o_pad) * 4                       # biases
        + 2 * t * o_pad * 4                             # output tile (f32)
        + n_pad * h_pad * 2                             # h scratch (bf16, resident)
        + (t * h_pad + t * o_pad) * 4                   # f32 accumulators
    )
    vmem_limit = int(min(max(2 * vmem_est, 16 * 2**20), 48 * 2**20))

    out_pad = pl.pallas_call(
        functools.partial(_fused_sage_kernel, t=t),
        out_shape=jax.ShapeDtypeStruct((n_pad, o_pad), jnp.float32),
        grid_spec=pltpu.PrefetchScalarGridSpec(
            num_scalar_prefetch=0,
            grid=grid,
            in_specs=[
                pl.BlockSpec((t, t), lambda p, r, k: (r, k)),        # A[r, k]
                pl.BlockSpec((t, f_pad), lambda p, r, k: (k, 0)),    # X source rows
                pl.BlockSpec((t, f_pad), lambda p, r, k: (r, 0)),    # X target rows
                pl.BlockSpec((f_pad, h_pad), lambda p, r, k: (0, 0)),
                pl.BlockSpec((f_pad, h_pad), lambda p, r, k: (0, 0)),
                pl.BlockSpec((1, h_pad), lambda p, r, k: (0, 0)),
                pl.BlockSpec((h_pad, o_pad), lambda p, r, k: (0, 0)),
                pl.BlockSpec((h_pad, o_pad), lambda p, r, k: (0, 0)),
                pl.BlockSpec((1, o_pad), lambda p, r, k: (0, 0)),
            ],
            out_specs=pl.BlockSpec((t, o_pad), lambda p, r, k: (r, 0)),
            scratch_shapes=[
                pltpu.VMEM((n_pad, h_pad), jnp.bfloat16),   # resident intermediate h
                pltpu.VMEM((t, h_pad), jnp.float32),        # layer-1 accumulator
                pltpu.VMEM((t, o_pad), jnp.float32),        # layer-2 accumulator
            ],
        ),
        compiler_params=pltpu.CompilerParams(
            dimension_semantics=("arbitrary", "arbitrary", "arbitrary"),
            vmem_limit_bytes=vmem_limit,
        ),
    )(a_p, x_p, x_p, w1l, w1r, b1, w2l, w2r, b2)

    return out_pad[:n, :f_out]


def dense_mean_adjacency(edge_index, num_nodes):
    """Dense row-normalized adjacency A[target, source] = 1/deg(target). Build once per graph."""
    src, dst = edge_index[0], edge_index[1]
    adj = jnp.zeros((num_nodes, num_nodes), jnp.float32)
    adj = adj.at[dst, src].add(1.0)
    deg = jnp.sum(adj, axis=1, keepdims=True)
    return adj / jnp.maximum(deg, 1.0)


def init_params(key, in_channels, hidden_channels, out_channels):
    k1, k2, k3, k4 = jax.random.split(key, 4)
    s1 = 1.0 / jnp.sqrt(in_channels)
    s2 = 1.0 / jnp.sqrt(hidden_channels)
    return {
        # stored pre-transposed: (Fin, Fout) so the kernel does X @ W directly
        "w1_l": jax.random.uniform(k1, (in_channels, hidden_channels), jnp.float32, -s1, s1),
        "w1_r": jax.random.uniform(k2, (in_channels, hidden_channels), jnp.float32, -s1, s1),
        "b1": jnp.zeros((1, hidden_channels), jnp.float32),
        "w2_l": jax.random.uniform(k3, (hidden_channels, out_channels), jnp.float32, -s2, s2),
        "w2_r": jax.random.uniform(k4, (hidden_channels, out_channels), jnp.float32, -s2, s2),
        "b2": jnp.zeros((1, out_channels), jnp.float32),
    }


if __name__ == "__main__":
    key = jax.random.PRNGKey(0)
    k_x, k_p = jax.random.split(key)

    num_nodes = 8
    in_channels = 16
    hidden_channels = 32
    out_channels = 8

    # deterministic node features
    x = jax.random.normal(k_x, (num_nodes, in_channels), jnp.float32)

    # deterministic small graph: directed ring + self loops (edge_index = [src, dst])
    src = jnp.arange(num_nodes, dtype=jnp.int32)
    dst = (src + 1) % num_nodes
    edge_index = jnp.stack(
        [jnp.concatenate([src, src]), jnp.concatenate([dst, src])], axis=0
    )

    params = init_params(k_p, in_channels, hidden_channels, out_channels)

    # adjacency is precomputed once per graph and reused across forwards
    a_norm = dense_mean_adjacency(edge_index, num_nodes)

    out = graphsage_forward(x, a_norm, params)
    out = jax.block_until_ready(out)

    # plain-JAX f32 reference for a sanity check (kernel feeds bf16 to the MXU,
    # accumulates f32 -> generous tolerance)
    h_ref = jnp.maximum(
        (a_norm @ x) @ params["w1_l"] + params["b1"] + x @ params["w1_r"], 0.0
    )
    ref = (a_norm @ h_ref) @ params["w2_l"] + params["b2"] + h_ref @ params["w2_r"]

    assert out.shape == (num_nodes, out_channels)
    assert bool(jnp.all(jnp.isfinite(out)))
    assert float(jnp.max(jnp.abs(out - ref))) < 0.1
    print("KERNEL_OK")
</pallas_src>

<mosaic_0001>
module attributes {stable_mosaic.version = 11 : i64} {
  func.func @_fused_sage_kernel(%arg0: i32, %arg1: i32, %arg2: i32, %arg3: memref<128x128xbf16, #tpu.memory_space<vmem>>, %arg4: memref<128x128xbf16, #tpu.memory_space<vmem>>, %arg5: memref<128x128xbf16, #tpu.memory_space<vmem>>, %arg6: memref<128x128xbf16, #tpu.memory_space<vmem>>, %arg7: memref<128x128xbf16, #tpu.memory_space<vmem>>, %arg8: memref<1x128xf32, #tpu.memory_space<vmem>>, %arg9: memref<128x128xbf16, #tpu.memory_space<vmem>>, %arg10: memref<128x128xbf16, #tpu.memory_space<vmem>>, %arg11: memref<1x128xf32, #tpu.memory_space<vmem>>, %arg12: memref<128x128xf32, #tpu.memory_space<vmem>>, %arg13: memref<128x128xbf16, #tpu.memory_space<vmem>>, %arg14: memref<128x128xf32, #tpu.memory_space<vmem>>, %arg15: memref<128x128xf32, #tpu.memory_space<vmem>>) attributes {dimension_semantics = [#tpu.dimension_semantics<arbitrary>, #tpu.dimension_semantics<arbitrary>, #tpu.dimension_semantics<arbitrary>], iteration_bounds = array<i64: 2, 1, 1>, scalar_prefetch = 0 : i64, scratch_operands = 3 : i64, tpu.core_type = #tpu.core_type<tc>, window_params = [{transform_indices = @transform_0, window_bounds = array<i64: 128, 128>}, {transform_indices = @transform_1, window_bounds = array<i64: 128, 128>}, {transform_indices = @transform_2, window_bounds = array<i64: 128, 128>}, {pipeline_mode = #tpu.pipeline_mode<synchronous>, transform_indices = @transform_3, window_bounds = array<i64: 128, 128>}, {pipeline_mode = #tpu.pipeline_mode<synchronous>, transform_indices = @transform_4, window_bounds = array<i64: 128, 128>}, {pipeline_mode = #tpu.pipeline_mode<synchronous>, transform_indices = @transform_5, window_bounds = array<i64: 1, 128>}, {pipeline_mode = #tpu.pipeline_mode<synchronous>, transform_indices = @transform_6, window_bounds = array<i64: 128, 128>}, {pipeline_mode = #tpu.pipeline_mode<synchronous>, transform_indices = @transform_7, window_bounds = array<i64: 128, 128>}, {pipeline_mode = #tpu.pipeline_mode<synchronous>, transform_indices = @transform_8, window_bounds = array<i64: 1, 128>}, {transform_indices = @transform_9, window_bounds = array<i64: 128, 128>}]} {
    %c128_i32 = arith.constant 128 : i32
    %0 = arith.muli %arg1, %c128_i32 : i32
    %1 = tpu.assume_multiple %0, 128 : i32
    %c128_i32_0 = arith.constant 128 : i32
    %2 = arith.muli %arg2, %c128_i32_0 : i32
    %3 = tpu.assume_multiple %2, 128 : i32
    %c0_i32 = arith.constant 0 : i32
    %4 = arith.cmpi eq, %arg0, %c0_i32 : i32
    %5 = arith.extui %4 : i1 to i32
    %c0_i32_1 = arith.constant 0 : i32
    %6 = arith.cmpi ne, %5, %c0_i32_1 : i32
    scf.if %6 {
      %c0_i32_3 = arith.constant 0 : i32
      %10 = arith.cmpi eq, %arg2, %c0_i32_3 : i32
      %11 = arith.extui %10 : i1 to i32
      %c0_i32_4 = arith.constant 0 : i32
      %12 = arith.cmpi ne, %11, %c0_i32_4 : i32
      scf.if %12 {
        %c0_17 = arith.constant 0 : index
        %c0_18 = arith.constant 0 : index
        %25 = vector.load %arg5[%c0_17, %c0_18] : memref<128x128xbf16, #tpu.memory_space<vmem>>, vector<128x128xbf16>
        %c0_19 = arith.constant 0 : index
        %c0_20 = arith.constant 0 : index
        %26 = vector.load %arg7[%c0_19, %c0_20] : memref<128x128xbf16, #tpu.memory_space<vmem>>, vector<128x128xbf16>
        %cst_21 = arith.constant dense<0.000000e+00> : vector<128x128xf32>
        %27 = tpu.matmul %25, %26, %cst_21 {dimension_numbers = #tpu.dot_dimension_numbers<[1], [0], [0], [1], [0, 0, 1, 1], [], []>} : vector<128x128xbf16>, vector<128x128xbf16>, vector<128x128xf32> -> vector<128x128xf32>
        %c0_22 = arith.constant 0 : index
        %c0_23 = arith.constant 0 : index
        %28 = vector.load %arg8[%c0_22, %c0_23] : memref<1x128xf32, #tpu.memory_space<vmem>>, vector<1x128xf32>
        %29 = vector.broadcast %28 : vector<1x128xf32> to vector<128x128xf32>
        %30 = arith.addf %27, %29 : vector<128x128xf32>
        %c0_24 = arith.constant 0 : index
        %c0_25 = arith.constant 0 : index
        %31 = vector.load %arg14[%c0_24, %c0_25] : memref<128x128xf32, #tpu.memory_space<vmem>>, vector<128x128xf32>
        tpu.vector_store %arg14[%c0_24, %c0_25], %30 {strides = array<i32>} : memref<128x128xf32, #tpu.memory_space<vmem>>, vector<128x128xf32>,
        %cst_26 = arith.constant 0.000000e+00 : f32
        %32 = vector.broadcast %cst_26 : f32 to vector<128x128xf32>
        %c0_27 = arith.constant 0 : index
        %c0_28 = arith.constant 0 : index
        %33 = vector.load %arg12[%c0_27, %c0_28] : memref<128x128xf32, #tpu.memory_space<vmem>>, vector<128x128xf32>
        tpu.vector_store %arg12[%c0_27, %c0_28], %32 {strides = array<i32>} : memref<128x128xf32, #tpu.memory_space<vmem>>, vector<128x128xf32>,
      } else {
      }
      %c0 = arith.constant 0 : index
      %c0_5 = arith.constant 0 : index
      %13 = vector.load %arg4[%c0, %c0_5] : memref<128x128xbf16, #tpu.memory_space<vmem>>, vector<128x128xbf16>
      %c0_6 = arith.constant 0 : index
      %c0_7 = arith.constant 0 : index
      %14 = vector.load %arg6[%c0_6, %c0_7] : memref<128x128xbf16, #tpu.memory_space<vmem>>, vector<128x128xbf16>
      %cst = arith.constant dense<0.000000e+00> : vector<128x128xf32>
      %15 = tpu.matmul %13, %14, %cst {dimension_numbers = #tpu.dot_dimension_numbers<[1], [0], [0], [1], [0, 0, 1, 1], [], []>} : vector<128x128xbf16>, vector<128x128xbf16>, vector<128x128xf32> -> vector<128x128xf32>
      %16 = arith.truncf %15 : vector<128x128xf32> to vector<128x128xbf16>
      %c0_8 = arith.constant 0 : index
      %c0_9 = arith.constant 0 : index
      %17 = vector.load %arg14[%c0_8, %c0_9] : memref<128x128xf32, #tpu.memory_space<vmem>>, vector<128x128xf32>
      %c0_10 = arith.constant 0 : index
      %c0_11 = arith.constant 0 : index
      %18 = vector.load %arg3[%c0_10, %c0_11] : memref<128x128xbf16, #tpu.memory_space<vmem>>, vector<128x128xbf16>
      %cst_12 = arith.constant dense<0.000000e+00> : vector<128x128xf32>
      %19 = tpu.matmul %18, %16, %cst_12 {dimension_numbers = #tpu.dot_dimension_numbers<[1], [0], [0], [1], [0, 0, 1, 1], [], []>} : vector<128x128xbf16>, vector<128x128xbf16>, vector<128x128xf32> -> vector<128x128xf32>
      %20 = arith.addf %17, %19 : vector<128x128xf32>
      %c0_13 = arith.constant 0 : index
      %c0_14 = arith.constant 0 : index
      %21 = vector.load %arg14[%c0_13, %c0_14] : memref<128x128xf32, #tpu.memory_space<vmem>>, vector<128x128xf32>
      tpu.vector_store %arg14[%c0_13, %c0_14], %20 {strides = array<i32>} : memref<128x128xf32, #tpu.memory_space<vmem>>, vector<128x128xf32>,
      %c0_i32_15 = arith.constant 0 : i32
      %22 = arith.cmpi eq, %arg2, %c0_i32_15 : i32
      %23 = arith.extui %22 : i1 to i32
      %c0_i32_16 = arith.constant 0 : i32
      %24 = arith.cmpi ne, %23, %c0_i32_16 : i32
      scf.if %24 {
        %c0_17 = arith.constant 0 : index
        %c0_18 = arith.constant 0 : index
        %25 = vector.load %arg14[%c0_17, %c0_18] : memref<128x128xf32, #tpu.memory_space<vmem>>, vector<128x128xf32>
        %cst_19 = arith.constant 0.000000e+00 : f32
        %26 = vector.broadcast %cst_19 : f32 to vector<128x128xf32>
        %27 = arith.maximumf %25, %26 : vector<128x128xf32>
        %28 = arith.truncf %27 : vector<128x128xf32> to vector<128x128xbf16>
        %29 = arith.index_cast %1 : i32 to index
        %c0_20 = arith.constant 0 : index
        %30 = vector.load %arg13[%29, %c0_20] : memref<128x128xbf16, #tpu.memory_space<vmem>>, vector<128x128xbf16>
        tpu.vector_store %arg13[%29, %c0_20], %28 {strides = array<i32>} : memref<128x128xbf16, #tpu.memory_space<vmem>>, vector<128x128xbf16>,
      } else {
      }
    } else {
    }
    %c1_i32 = arith.constant 1 : i32
    %7 = arith.cmpi eq, %arg0, %c1_i32 : i32
    %8 = arith.extui %7 : i1 to i32
    %c0_i32_2 = arith.constant 0 : i32
    %9 = arith.cmpi ne, %8, %c0_i32_2 : i32
    scf.if %9 {
      %c0_i32_3 = arith.constant 0 : i32
      %10 = arith.cmpi eq, %arg2, %c0_i32_3 : i32
      %11 = arith.extui %10 : i1 to i32
      %c0_i32_4 = arith.constant 0 : i32
      %12 = arith.cmpi ne, %11, %c0_i32_4 : i32
      scf.if %12 {
        %26 = arith.index_cast %1 : i32 to index
        %c0_16 = arith.constant 0 : index
        %27 = vector.load %arg13[%26, %c0_16] : memref<128x128xbf16, #tpu.memory_space<vmem>>, vector<128x128xbf16>
        %c0_17 = arith.constant 0 : index
        %c0_18 = arith.constant 0 : index
        %28 = vector.load %arg10[%c0_17, %c0_18] : memref<128x128xbf16, #tpu.memory_space<vmem>>, vector<128x128xbf16>
        %cst_19 = arith.constant dense<0.000000e+00> : vector<128x128xf32>
        %29 = tpu.matmul %27, %28, %cst_19 {dimension_numbers = #tpu.dot_dimension_numbers<[1], [0], [0], [1], [0, 0, 1, 1], [], []>} : vector<128x128xbf16>, vector<128x128xbf16>, vector<128x128xf32> -> vector<128x128xf32>
        %c0_20 = arith.constant 0 : index
        %c0_21 = arith.constant 0 : index
        %30 = vector.load %arg11[%c0_20, %c0_21] : memref<1x128xf32, #tpu.memory_space<vmem>>, vector<1x128xf32>
        %31 = vector.broadcast %30 : vector<1x128xf32> to vector<128x128xf32>
        %32 = arith.addf %29, %31 : vector<128x128xf32>
        %c0_22 = arith.constant 0 : index
        %c0_23 = arith.constant 0 : index
        %33 = vector.load %arg15[%c0_22, %c0_23] : memref<128x128xf32, #tpu.memory_space<vmem>>, vector<128x128xf32>
        tpu.vector_store %arg15[%c0_22, %c0_23], %32 {strides = array<i32>} : memref<128x128xf32, #tpu.memory_space<vmem>>, vector<128x128xf32>,
      } else {
      }
      %13 = arith.index_cast %3 : i32 to index
      %c0 = arith.constant 0 : index
      %14 = vector.load %arg13[%13, %c0] : memref<128x128xbf16, #tpu.memory_space<vmem>>, vector<128x128xbf16>
      %c0_5 = arith.constant 0 : index
      %c0_6 = arith.constant 0 : index
      %15 = vector.load %arg9[%c0_5, %c0_6] : memref<128x128xbf16, #tpu.memory_space<vmem>>, vector<128x128xbf16>
      %cst = arith.constant dense<0.000000e+00> : vector<128x128xf32>
      %16 = tpu.matmul %14, %15, %cst {dimension_numbers = #tpu.dot_dimension_numbers<[1], [0], [0], [1], [0, 0, 1, 1], [], []>} : vector<128x128xbf16>, vector<128x128xbf16>, vector<128x128xf32> -> vector<128x128xf32>
      %17 = arith.truncf %16 : vector<128x128xf32> to vector<128x128xbf16>
      %c0_7 = arith.constant 0 : index
      %c0_8 = arith.constant 0 : index
      %18 = vector.load %arg15[%c0_7, %c0_8] : memref<128x128xf32, #tpu.memory_space<vmem>>, vector<128x128xf32>
      %c0_9 = arith.constant 0 : index
      %c0_10 = arith.constant 0 : index
      %19 = vector.load %arg3[%c0_9, %c0_10] : memref<128x128xbf16, #tpu.memory_space<vmem>>, vector<128x128xbf16>
      %cst_11 = arith.constant dense<0.000000e+00> : vector<128x128xf32>
      %20 = tpu.matmul %19, %17, %cst_11 {dimension_numbers = #tpu.dot_dimension_numbers<[1], [0], [0], [1], [0, 0, 1, 1], [], []>} : vector<128x128xbf16>, vector<128x128xbf16>, vector<128x128xf32> -> vector<128x128xf32>
      %21 = arith.addf %18, %20 : vector<128x128xf32>
      %c0_12 = arith.constant 0 : index
      %c0_13 = arith.constant 0 : index
      %22 = vector.load %arg15[%c0_12, %c0_13] : memref<128x128xf32, #tpu.memory_space<vmem>>, vector<128x128xf32>
      tpu.vector_store %arg15[%c0_12, %c0_13], %21 {strides = array<i32>} : memref<128x128xf32, #tpu.memory_space<vmem>>, vector<128x128xf32>,
      %c0_i32_14 = arith.constant 0 : i32
      %23 = arith.cmpi eq, %arg2, %c0_i32_14 : i32
      %24 = arith.extui %23 : i1 to i32
      %c0_i32_15 = arith.constant 0 : i32
      %25 = arith.cmpi ne, %24, %c0_i32_15 : i32
      scf.if %25 {
        %c0_16 = arith.constant 0 : index
        %c0_17 = arith.constant 0 : index
        %26 = vector.load %arg15[%c0_16, %c0_17] : memref<128x128xf32, #tpu.memory_space<vmem>>, vector<128x128xf32>
        %c0_18 = arith.constant 0 : index
        %c0_19 = arith.constant 0 : index
        %27 = vector.load %arg12[%c0_18, %c0_19] : memref<128x128xf32, #tpu.memory_space<vmem>>, vector<128x128xf32>
        tpu.vector_store %arg12[%c0_18, %c0_19], %26 {strides = array<i32>} : memref<128x128xf32, #tpu.memory_space<vmem>>, vector<128x128xf32>,
      } else {
      }
    } else {
    }
    return
  }
  func.func @transform_0(%arg0: i32, %arg1: i32, %arg2: i32) -> (i32, i32) {
    %c0_i32 = arith.constant 0 : i32
    return %arg1, %arg2 : i32, i32
  }
  func.func @transform_1(%arg0: i32, %arg1: i32, %arg2: i32) -> (i32, i32) {
    %c0_i32 = arith.constant 0 : i32
    %c0_i32_0 = arith.constant 0 : i32
    return %arg2, %c0_i32 : i32, i32
  }
  func.func @transform_2(%arg0: i32, %arg1: i32, %arg2: i32) -> (i32, i32) {
    %c0_i32 = arith.constant 0 : i32
    %c0_i32_0 = arith.constant 0 : i32
    return %arg1, %c0_i32 : i32, i32
  }
  func.func @transform_3(%arg0: i32, %arg1: i32, %arg2: i32) -> (i32, i32) {
    %c0_i32 = arith.constant 0 : i32
    %c0_i32_0 = arith.constant 0 : i32
    %c0_i32_1 = arith.constant 0 : i32
    return %c0_i32, %c0_i32_0 : i32, i32
  }
  func.func @transform_4(%arg0: i32, %arg1: i32, %arg2: i32) -> (i32, i32) {
    %c0_i32 = arith.constant 0 : i32
    %c0_i32_0 = arith.constant 0 : i32
    %c0_i32_1 = arith.constant 0 : i32
    return %c0_i32, %c0_i32_0 : i32, i32
  }
  func.func @transform_5(%arg0: i32, %arg1: i32, %arg2: i32) -> (i32, i32) {
    %c0_i32 = arith.constant 0 : i32
    %c0_i32_0 = arith.constant 0 : i32
    %c0_i32_1 = arith.constant 0 : i32
    return %c0_i32, %c0_i32_0 : i32, i32
  }
  func.func @transform_6(%arg0: i32, %arg1: i32, %arg2: i32) -> (i32, i32) {
    %c0_i32 = arith.constant 0 : i32
    %c0_i32_0 = arith.constant 0 : i32
    %c0_i32_1 = arith.constant 0 : i32
    return %c0_i32, %c0_i32_0 : i32, i32
  }
  func.func @transform_7(%arg0: i32, %arg1: i32, %arg2: i32) -> (i32, i32) {
    %c0_i32 = arith.constant 0 : i32
    %c0_i32_0 = arith.constant 0 : i32
    %c0_i32_1 = arith.constant 0 : i32
    return %c0_i32, %c0_i32_0 : i32, i32
  }
  func.func @transform_8(%arg0: i32, %arg1: i32, %arg2: i32) -> (i32, i32) {
    %c0_i32 = arith.constant 0 : i32
    %c0_i32_0 = arith.constant 0 : i32
    %c0_i32_1 = arith.constant 0 : i32
    return %c0_i32, %c0_i32_0 : i32, i32
  }
  func.func @transform_9(%arg0: i32, %arg1: i32, %arg2: i32) -> (i32, i32) {
    %c0_i32 = arith.constant 0 : i32
    %c0_i32_0 = arith.constant 0 : i32
    return %arg1, %c0_i32 : i32, i32
  }
}

</mosaic_0001>

<bundles_post_ra>
// kernel: tpu_custom_call.1
= control target key start
LH: loop header
LB: loop body
LE: loop exit
PB: predicated region body
PF: predicated region fallthrough
CT: control target
= control target key end

     0   :  { %14 = vsyncpa [#allocation6], 0  ;;  %s3009_s0 = inlined_call_operand.hbm [shape: bf16[128,128], index: 0, kind: input, shape index: {}]   ;;  %s3010_s1 = inlined_call_operand.hbm [shape: bf16[128,128], index: 1, kind: input, shape index: {}]   ;;  %s3011_s2 = inlined_call_operand.hbm [shape: bf16[128,128], index: 2, kind: input, shape index: {}]   ;;  %s3012_s3 = inlined_call_operand.hbm [shape: bf16[128,128], index: 3, kind: input, shape index: {}]   ;;  %s3013_s4 = inlined_call_operand.hbm [shape: bf16[128,128], index: 4, kind: input, shape index: {}]   ;;  %s3014_s5 = inlined_call_operand.vmem [shape: f32[1,128], index: 5, kind: input, shape index: {}]   ;;  %s3015_s6 = inlined_call_operand.hbm [shape: bf16[128,128], index: 6, kind: input, shape index: {}]   ;;  %s3016_s7 = inlined_call_operand.hbm [shape: bf16[128,128], index: 7, kind: input, shape index: {}]   ;;  %s3017_s8 = inlined_call_operand.vmem [shape: f32[1,128], index: 8, kind: input, shape index: {}]   ;;  %s3018_s9 = inlined_call_operand.hbm [shape: f32[128,128], index: 9, kind: output, shape index: {}]  }
   0x1   :  { %15 = vsyncpa [#allocation9], 0 }
   0x2   :  { %16 = vsyncpa [#allocation12], 0 }
   0x3   :  { %17 = vsyncpa [#allocation15], 0 }
   0x4   :  { %18 = vsyncpa [#allocation7], 0  ;;  %s2814_s30 = smov 0   ;;  %s2816_s10 = smov 0  }
   0x5   :  { %s2818_s11 = smov 0  }
   0x6 LB: > { %s3019_s12 = sadd.s32 4294967295, %s2749_s11   ;;  %p1843_p0 = scmp.ge.s32.totalorder %s2749_s11, 1  ;;  %s2749_s11 = sphi %s2818_s11, %s24_s11   ;;  %s2745_s10 = sphi %s2816_s10, %s3025_s10   ;;  %s2741_s30 = sphi %s2814_s30, %s3024_s30  }
   0x7   : > { %p280_p1 = scmp.lt.s32.totalorder %s2749_s11, 3  ;;  %p2834_p2 = scmp.eq.s32.totalorder %s3019_s12, 0 }
   0x8   : > { %s312_s16 = sshll.u32 %s3010_s1, 4  ;;  %s343_s20 = sshll.u32 %s3012_s3, 4  ;;  %s313_s16 = int_to_ptr.hbm [resolvable:$true] %s312_s16  ;;  %s344_s20 = int_to_ptr.hbm [resolvable:$true] %s343_s20 }
   0x9   : > { %p2841_p3 = pnand %p1843_p0, %p280_p1  ;;  %s2751_s21 = smov [#allocation8]  }
   0xa   : > { %s314_s22 = sshll.u32 %s2751_s21, 4  ;;  %s2752_s24 = smov [#allocation11]   ;;  %s315_s22 = int_to_ptr.vmem [resolvable:$true] %s314_s22 }
   0xb   : > { %p2392_p4 = pneg %p2841_p3  ;;  %s345_s25 = sshll.u32 %s2752_s24, 4  ;;  %s346_s25 = int_to_ptr.vmem [resolvable:$true] %s345_s25 }
   0xc   : > { %s374_s28 = sshll.u32 %s3015_s6, 4  ;;  %s2753_s29 = smov 64   ;;  %s375_s28 = int_to_ptr.hbm [resolvable:$true] %s374_s28 }
   0xd   : > { %p2852_p5 = pnand %p2834_p2, %p2392_p4  ;;  %s2754_s14 = smov 4  }
   0xe   : > { %s2755_s15 = smov [#allocation14]   ;;  %s43_s19 = sadd.s32 1, %s2745_s10 }
   0xf   : > { %2398 = dma.hbm_to_vmem [thread:$0]  (!%p2852_p5), %s313_s16, 1024, %s315_s22, [#allocation9], %s2753_s29, %s2753_s29, %s2754_s14  }
  0x10   : > { %2404 = dma.hbm_to_vmem [thread:$0]  (!%p2852_p5), %s344_s20, 1024, %s346_s25, [#allocation12], %s2753_s29, %s2753_s29, %s2754_s14  }
  0x11   : > { %s376_s18 = sshll.u32 %s2755_s15, 4  ;;  %s295_s16 = sshll.u32 %s3009_s0, 4  ;;  %s377_s18 = int_to_ptr.vmem [resolvable:$true] %s376_s18  ;;  %s296_s16 = int_to_ptr.hbm [resolvable:$true] %s295_s16 }
  0x12   : > { %2410 = dma.hbm_to_vmem [thread:$0]  (!%p2852_p5), %s375_s28, 1024, %s377_s18, [#allocation15], %s2753_s29, %s2753_s29, %s2754_s14  }
  0x13   : > { %p45_p6 = scmp.ge.s32.totalorder %s43_s19, 2  ;;  %s329_s25 = sshll.u32 %s3011_s2, 4  ;;  %s330_s25 = int_to_ptr.hbm [resolvable:$true] %s329_s25 }
  0x14   : > { %s2756_s26 = smov [#allocation5]   ;;  %s2757_s28 = smov [#allocation10]  }
  0x15   : > { %s3027_s19 = smov (%p45_p6, %s43_s19), 0  ;;  %s297_s27 = sshll.u32 %s2756_s26, 4  ;;  %s298_s27 = int_to_ptr.vmem [resolvable:$true] %s297_s27 }
  0x16   : > { %2395 = dma.hbm_to_vmem [thread:$0]  (!%p2852_p5), %s296_s16, 1024, %s298_s27, [#allocation6], %s2753_s29, %s2753_s29, %s2754_s14  }
  0x17   : > { %s331_s15 = sshll.u32 %s2757_s28, 4  ;;  %s357_s24 = sshll.u32 %s3013_s4, 4  ;;  %s332_s15 = int_to_ptr.vmem [resolvable:$true] %s331_s15  ;;  %s358_s24 = int_to_ptr.hbm [resolvable:$true] %s357_s24 }
  0x18   : > { %2401 = dma.hbm_to_vmem [thread:$0]  (!%p2852_p5), %s330_s25, 1024, %s332_s15, [#allocation9], %s2753_s29, %s2753_s29, %s2754_s14  }
  0x19   : > { %s388_s26 = sshll.u32 %s3016_s7, 4  ;;  %s2758_s12 = smov [#allocation13]   ;;  %s389_s26 = int_to_ptr.hbm [resolvable:$true] %s388_s26 }
  0x1a   : > { %s359_s16 = sshll.u32 %s2758_s12, 4  ;;  %s2759_s27 = smov [#allocation16]   ;;  %s360_s16 = int_to_ptr.vmem [resolvable:$true] %s359_s16 }
  0x1b   : > { %2407 = dma.hbm_to_vmem [thread:$0]  (!%p2852_p5), %s358_s24, 1024, %s360_s16, [#allocation12], %s2753_s29, %s2753_s29, %s2754_s14  }
  0x1c   : > { %s390_s28 = sshll.u32 %s2759_s27, 4  ;;  %409 = sbr.rel (%p2841_p3) target bundleno = 1055 (0x41f), region = 56  ;;  %s391_s28 = int_to_ptr.vmem [resolvable:$true] %s390_s28 }
  0x1d   : > { %2413 = dma.hbm_to_vmem [thread:$0]  (!%p2852_p5), %s389_s26, 1024, %s391_s28, [#allocation15], %s2753_s29, %s2753_s29, %s2754_s14  }
  0x21   : > { %2720 = dma.done.wait (%p2834_p2), [#allocation6], 1024  }
  0x22   : > { %2722 = vsyncadd (%p2834_p2), [#allocation6], 4294966272 }
  0x23   : > { %2724 = dma.done.wait (%p2834_p2), [#allocation9], 2048  }
  0x24   : > { %2726 = vsyncadd (%p2834_p2), [#allocation9], 4294965248 }
  0x25   : > { %2728 = dma.done.wait (%p2834_p2), [#allocation12], 2048  }
  0x26   : > { %2730 = vsyncadd (%p2834_p2), [#allocation12], 4294965248 }
  0x27   : > { %2732 = dma.done.wait (%p2834_p2), [#allocation15], 2048  }
  0x28   : > { %2734 = vsyncadd (%p2834_p2), [#allocation15], 4294965248  ;;  %p1859_p7 = scmp.ne.s32.totalorder %s2741_s30, 0 }
  0x2a   : > { %475 = sbr.rel (%p1859_p7) target bundleno = 546 (0x222), region = 88 }
  0x2f   : > { %v2200_v0 = vld [vmem:[#allocation13 + $0x38] sm:$0xff]  ;;  %v2760_v2 = vmov 0.0   ;;  %v2199_v3 = vld [vmem:[#allocation13 + $0x30] sm:$0xff]  ;;  %v2198_v5 = vld [vmem:[#allocation13 + $0x28] sm:$0xff] }
  0x30   : > { %v2216_v1 = vld [vmem:[#allocation11 + $0x38] sm:$0xff]  ;;  %677 = vst [vmem:[#allocation17] sm:$0xff] %v2760_v2  ;;  %2312 = vmatpush.bf16.msra.mxu3 %v2200_v0  ;;  %v2215_v4 = vld [vmem:[#allocation11 + $0x30] sm:$0xff]  ;;  %612 = vmatpush.bf16.msra.mxu0 %v2200_v0  ;;  %v2214_v6 = vld [vmem:[#allocation11 + $0x28] sm:$0xff] }
  0x31   : > { %678 = vst [vmem:[#allocation17 + $0x8] sm:$0xff] %v2760_v2  ;;  %821 = vmatpush.bf16.msra.mxu1 %v2216_v1  ;;  %v2197_v7 = vld [vmem:[#allocation13 + $0x20] sm:$0xff]  ;;  %v2196_v9 = vld [vmem:[#allocation13 + $0x18] sm:$0xff]  ;;  %v2195_v11 = vld [vmem:[#allocation13 + $0x10] sm:$0xff] }
  0x32   : > { %679 = vst [vmem:[#allocation17 + $0x10] sm:$0xff] %v2760_v2  ;;  %v2213_v8 = vld [vmem:[#allocation11 + $0x20] sm:$0xff]  ;;  %v2212_v10 = vld [vmem:[#allocation11 + $0x18] sm:$0xff]  ;;  %v2211_v12 = vld [vmem:[#allocation11 + $0x10] sm:$0xff] }
  0x33   : > { %680 = vst [vmem:[#allocation17 + $0x18] sm:$0xff] %v2760_v2  ;;  %v2194_v13 = vld [vmem:[#allocation13 + $0x8] sm:$0xff]  ;;  %v2193_v15 = vld [vmem:[#allocation13] sm:$0xff]  ;;  %v2191_v17 = vld [vmem:[#allocation10 + $0x30] sm:$0xff] }
  0x34   : > { %681 = vst [vmem:[#allocation17 + $0x20] sm:$0xff] %v2760_v2  ;;  %2313 = vmatpush.bf16.msra.mxu3 %v2199_v3  ;;  %613 = vmatpush.bf16.msra.mxu0 %v2199_v3  ;;  %v2210_v14 = vld [vmem:[#allocation11 + $0x8] sm:$0xff]  ;;  %v2209_v16 = vld [vmem:[#allocation11] sm:$0xff]  ;;  %v2192_v19 = vld [vmem:[#allocation10 + $0x38] sm:$0xff] }
  0x35   : > { %682 = vst [vmem:[#allocation17 + $0x28] sm:$0xff] %v2760_v2  ;;  %822 = vmatpush.bf16.msra.mxu1 %v2215_v4  ;;  %v2201_v18 = vld [vmem:[#allocation8] sm:$0xff]  ;;  %v2202_v20 = vld [vmem:[#allocation8 + $0x8] sm:$0xff]  ;;  %v2203_v21 = vld [vmem:[#allocation8 + $0x10] sm:$0xff] }
  0x36   : > { %683 = vst [vmem:[#allocation17 + $0x30] sm:$0xff] %v2760_v2  ;;  %v2207_v22 = vld [vmem:[#allocation8 + $0x30] sm:$0xff]  ;;  %v2204_v23 = vld [vmem:[#allocation8 + $0x18] sm:$0xff]  ;;  %v2205_v25 = vld [vmem:[#allocation8 + $0x20] sm:$0xff] }
  0x37   : > { %684 = vst [vmem:[#allocation17 + $0x38] sm:$0xff] %v2760_v2  ;;  %v2208_v24 = vld [vmem:[#allocation8 + $0x38] sm:$0xff]  ;;  %v2206_v26 = vld [vmem:[#allocation8 + $0x28] sm:$0xff]  ;;  %v2185_v49 = vld [vmem:[#allocation10] sm:$0xff] }
  0x38   : > { %685 = vst [vmem:[#allocation17 + $0x40] sm:$0xff] %v2760_v2  ;;  %2314 = vmatpush.bf16.msra.mxu3 %v2198_v5  ;;  %614 = vmatpush.bf16.msra.mxu0 %v2198_v5  ;;  %v2186_v53 = vld [vmem:[#allocation10 + $0x8] sm:$0xff]  ;;  %v2187_v57 = vld [vmem:[#allocation10 + $0x10] sm:$0xff]  ;;  %v2217_v58 = vld [vmem:[#allocation5] sm:$0xff] }
  0x39   : > { %686 = vst [vmem:[#allocation17 + $0x48] sm:$0xff] %v2760_v2  ;;  %823 = vmatpush.bf16.msra.mxu1 %v2214_v6  ;;  %v2223_v59 = vld [vmem:[#allocation5 + $0x30] sm:$0xff]  ;;  %v2188_v60 = vld [vmem:[#allocation10 + $0x18] sm:$0xff]  ;;  %v2218_v61 = vld [vmem:[#allocation5 + $0x8] sm:$0xff] }
  0x3a   : > { %687 = vst [vmem:[#allocation17 + $0x50] sm:$0xff] %v2760_v2  ;;  %v2224_v62 = vld [vmem:[#allocation5 + $0x38] sm:$0xff]  ;;  %v2189_v63 = vld [vmem:[#allocation10 + $0x20] sm:$0xff]  ;;  %v2219_v0 = vld [vmem:[#allocation5 + $0x10] sm:$0xff] }
  0x3b   : > { %688 = vst [vmem:[#allocation17 + $0x58] sm:$0xff] %v2760_v2  ;;  %v2221_v3 = vld [vmem:[#allocation5 + $0x20] sm:$0xff] }
  0x3c   : > { %689 = vst [vmem:[#allocation17 + $0x60] sm:$0xff] %v2760_v2  ;;  %2315 = vmatpush.bf16.msra.mxu3 %v2197_v7  ;;  %615 = vmatpush.bf16.msra.mxu0 %v2197_v7 }
  0x3d   : > { %690 = vst [vmem:[#allocation17 + $0x68] sm:$0xff] %v2760_v2  ;;  %824 = vmatpush.bf16.msra.mxu1 %v2213_v8 }
  0x3e   : > { %691 = vst [vmem:[#allocation17 + $0x70] sm:$0xff] %v2760_v2 }
  0x3f   : > { %692 = vst [vmem:[#allocation17 + $0x78] sm:$0xff] %v2760_v2  ;;  %v2220_v2 = vld [vmem:[#allocation5 + $0x18] sm:$0xff] }
  0x40   : > { %2316 = vmatpush.bf16.msra.mxu3 %v2196_v9  ;;  %616 = vmatpush.bf16.msra.mxu0 %v2196_v9 }
  0x41   : > { %825 = vmatpush.bf16.msra.mxu1 %v2212_v10 }
  0x44   : > { %2317 = vmatpush.bf16.msra.mxu3 %v2195_v11  ;;  %617 = vmatpush.bf16.msra.mxu0 %v2195_v11 }
  0x45   : > { %826 = vmatpush.bf16.msra.mxu1 %v2211_v12 }
  0x48   : > { %2318 = vmatpush.bf16.msra.mxu3 %v2194_v13  ;;  %618 = vmatpush.bf16.msra.mxu0 %v2194_v13 }
  0x49   : > { %827 = vmatpush.bf16.msra.mxu1 %v2210_v14 }
  0x4c   : > { %2319 = vmatpush.bf16.msra.mxu3 %v2193_v15  ;;  %619 = vmatpush.bf16.msra.mxu0 %v2193_v15 }
  0x4d   : > { %828 = vmatpush.bf16.msra.mxu1 %v2209_v16 }
  0x4f   : > { %650 = vmatmul.bf16.vlgmr.msra.gmra.mxu3 %v2191_v17  ;;  %620 = vmatmul.bf16.vlgmr.msra.gmra.mxu0 %v2185_v49 }
  0x50   : > { %2320 = vmatpush.bf16.msrb.mxu3 %v2216_v1  ;;  %829 = vmatmul.bf16.vlgmr.msra.gmra.mxu1 %v2201_v18  ;;  %v2190_v1 = vld [vmem:[#allocation10 + $0x28] sm:$0xff] }
  0x54   : > { %2321 = vmatpush.bf16.msrb.mxu3 %v2215_v4  ;;  %v2222_v4 = vld [vmem:[#allocation5 + $0x28] sm:$0xff] }
  0x58   : > { %2322 = vmatpush.bf16.msrb.mxu3 %v2214_v6 }
  0x5c   : > { %2323 = vmatpush.bf16.msrb.mxu3 %v2213_v8 }
  0x5f   : > { %655 = vmatmul.bf16.gmra.mxu3 %v2192_v19  ;;  %625 = vmatmul.bf16.gmra.mxu0 %v2186_v53 }
  0x60   : > { %2324 = vmatpush.bf16.msrb.mxu3 %v2212_v10  ;;  %834 = vmatmul.bf16.gmra.mxu1 %v2202_v20  ;;  %v2939_v10 = vld [vmem:[%s3014_s5] ss:$0 sm:$0xff] }
  0x64   : > { %2325 = vmatpush.bf16.msrb.mxu3 %v2211_v12 }
  0x68   : > { %2326 = vmatpush.bf16.msrb.mxu3 %v2210_v14 }
  0x6c   : > { %2327 = vmatpush.bf16.msrb.mxu3 %v2209_v16 }
  0x6f   : > { %859 = vmatmul.bf16.vlgmr.msrb.gmra.mxu3 %v2207_v22  ;;  %630 = vmatmul.bf16.gmra.mxu0 %v2187_v57 }
  0x70   : > { %839 = vmatmul.bf16.gmra.mxu1 %v2203_v21 }
  0x7f   : > { %864 = vmatmul.bf16.gmra.mxu3 %v2208_v24  ;;  %635 = vmatmul.bf16.gmra.mxu0 %v2188_v60 }
  0x80   : > { %844 = vmatmul.bf16.gmra.mxu1 %v2204_v23 }
  0x8f   : > { %640 = vmatmul.bf16.gmra.mxu0 %v2189_v63 }
  0x90   : > { %849 = vmatmul.bf16.gmra.mxu1 %v2205_v25 }
  0x9f   : > { %645 = vmatmul.bf16.gmra.mxu0 %v2190_v1 }
  0xa0   : > { %854 = vmatmul.bf16.gmra.mxu1 %v2206_v26 }
  0xcc   : > { %v621_v5 = vpop.f32.mrf.mxu0 }
  0xcd   : > { %v830_v27 = vpop.f32.mrf.mxu1  ;;  %v622_v11 = vadd.f32 %v2939_v10, %v621_v5 }
  0xd2   : > { %v2928_v28 = vpop.f32.mrf.mxu3 }
  0xd3   : > { %v652_v13 = vadd.f32 %v2939_v10, %v2928_v28 }
  0xd4   : > { %v623_v6 = vpop.f32.mrf.mxu0 }
  0xd5   : > { %v832_v29 = vpop.f32.mrf.mxu1  ;;  %v624_v15 = vadd.f32 %v2939_v10, %v623_v6 }
  0xd6   : > { %v870_v30 = vpack.c.bf16 %v832_v29, %v830_v27 }
  0xda   : > { %v2930_v31 = vpop.f32.mrf.mxu3 }
  0xdb   : > { %v654_v14 = vadd.f32 %v2939_v10, %v2930_v31 }
  0xdc   : > { %v626_v7 = vpop.f32.mrf.mxu0 }
  0xdd   : > { %v835_v32 = vpop.f32.mrf.mxu1  ;;  %v627_v31 = vadd.f32 %v2939_v10, %v626_v7 }
  0xe2   : > { %v2932_v33 = vpop.f32.mrf.mxu3 }
  0xe4   : > { %v628_v12 = vpop.f32.mrf.mxu0 }
  0xe5   : > { %v837_v34 = vpop.f32.mrf.mxu1 }
  0xe6   : > { %v871_v35 = vpack.c.bf16 %v837_v34, %v835_v32  ;;  %v657_v32 = vadd.f32 %v2939_v10, %v2932_v33 }
  0xea   : > { %v2934_v36 = vpop.f32.mrf.mxu3 }
  0xeb   : > { %v659_v34 = vadd.f32 %v2939_v10, %v2934_v36 }
  0xec   : > { %v631_v29 = vpop.f32.mrf.mxu0 }
  0xed   : > { %v840_v37 = vpop.f32.mrf.mxu1  ;;  %v632_v36 = vadd.f32 %v2939_v10, %v631_v29 }
  0xf2   : > { %v860_v38 = vpop.f32.mrf.mxu3 }
  0xf5   : > { %v842_v39 = vpop.f32.mrf.mxu1 }
  0xf6   : > { %v872_v56 = vpack.c.bf16 %v842_v39, %v840_v37  ;;  %v633_v39 = vpop.f32.mrf.mxu0 }
  0xfa   : > { %v862_v40 = vpop.f32.mrf.mxu3 }
  0xfb   : > { %v876_v47 = vpack.c.bf16 %v862_v40, %v860_v38 }
  0xfd   : > { %v845_v41 = vpop.f32.mrf.mxu1 }
 0x102   : > { %v865_v42 = vpop.f32.mrf.mxu3 }
 0x105   : > { %v847_v43 = vpop.f32.mrf.mxu1 }
 0x106   : > { %v873_v55 = vpack.c.bf16 %v847_v43, %v845_v41 }
 0x10a   : > { %v867_v44 = vpop.f32.mrf.mxu3 }
 0x10b   : > { %v877_v45 = vpack.c.bf16 %v867_v44, %v865_v42 }
 0x10d   : > { %v850_v46 = vpop.f32.mrf.mxu1  ;;  %958 = vmatpush.bf16.msra.mxu2 %v877_v45  ;;  %2328 = vmatpush.bf16.msra.mxu3 %v877_v45 }
 0x111   : > { %959 = vmatpush.bf16.msra.mxu2 %v876_v47  ;;  %2329 = vmatpush.bf16.msra.mxu3 %v876_v47 }
 0x115   : > { %v852_v48 = vpop.f32.mrf.mxu1 }
 0x116   : > { %v874_v54 = vpack.c.bf16 %v852_v48, %v850_v46 }
 0x11d   : > { %v855_v50 = vpop.f32.mrf.mxu1 }
 0x125   : > { %v857_v51 = vpop.f32.mrf.mxu1 }
 0x126   : > { %v875_v52 = vpack.c.bf16 %v857_v51, %v855_v50  ;;  %v636_v50 = vpop.f32.mrf.mxu0  ;;  %v634_v51 = vadd.f32 %v2939_v10, %v633_v39 }
 0x127   : > { %v637_v60 = vadd.f32 %v2939_v10, %v636_v50 }
 0x128   : > { %960 = vmatpush.bf16.msra.mxu2 %v875_v52  ;;  %2330 = vmatpush.bf16.msra.mxu3 %v875_v52 }
 0x12c   : > { %961 = vmatpush.bf16.msra.mxu2 %v874_v54  ;;  %2331 = vmatpush.bf16.msra.mxu3 %v874_v54 }
 0x12e   : > { %v638_v57 = vpop.f32.mrf.mxu0 }
 0x130   : > { %962 = vmatpush.bf16.msra.mxu2 %v873_v55  ;;  %2332 = vmatpush.bf16.msra.mxu3 %v873_v55 }
 0x134   : > { %963 = vmatpush.bf16.msra.mxu2 %v872_v56  ;;  %2333 = vmatpush.bf16.msra.mxu3 %v872_v56 }
 0x138   : > { %964 = vmatpush.bf16.msra.mxu2 %v871_v35  ;;  %2334 = vmatpush.bf16.msra.mxu3 %v871_v35  ;;  %v629_v35 = vadd.f32 %v2939_v10, %v628_v12 }
 0x13c   : > { %965 = vmatpush.bf16.msra.mxu2 %v870_v30  ;;  %2335 = vmatpush.bf16.msra.mxu3 %v870_v30 }
 0x13f   : > { %966 = vmatmul.bf16.vlgmr.msra.gmra.mxu2 %v2217_v58  ;;  %996 = vmatmul.bf16.vlgmr.msra.gmra.mxu3 %v2223_v59 }
 0x14f   : > { %971 = vmatmul.bf16.gmra.mxu2 %v2218_v61  ;;  %1001 = vmatmul.bf16.gmra.mxu3 %v2224_v62  ;;  %v641_v61 = vpop.f32.mrf.mxu0  ;;  %v639_v62 = vadd.f32 %v2939_v10, %v638_v57 }
 0x150   : > { %v642_v7 = vadd.f32 %v2939_v10, %v641_v61 }
 0x157   : > { %v643_v5 = vpop.f32.mrf.mxu0 }
 0x15f   : > { %976 = vmatmul.bf16.gmra.mxu2 %v2219_v0 }
 0x16f   : > { %981 = vmatmul.bf16.gmra.mxu2 %v2220_v2 }
 0x17f   : > { %986 = vmatmul.bf16.gmra.mxu2 %v2221_v3 }
 0x18f   : > { %991 = vmatmul.bf16.gmra.mxu2 %v2222_v4 }
 0x1c2   : > { %v967_v8 = vpop.f32.mrf.mxu2  ;;  %v997_v9 = vpop.f32.mrf.mxu3 }
 0x1c3   : > { %v1007_v16 = vadd.f32 %v967_v8, %v622_v11  ;;  %v1019_v17 = vadd.f32 %v997_v9, %v652_v13  ;;  %v644_v8 = vadd.f32 %v2939_v10, %v643_v5  ;;  %v646_v13 = vpop.f32.mrf.mxu0 }
 0x1c5   : > { %v1058_v22 = vmax.f32 %v1007_v16, 0.0  ;;  %v1070_v23 = vmax.f32 %v1019_v17, 0.0 }
 0x1ca   : > { %v969_v18 = vpop.f32.mrf.mxu2  ;;  %v999_v19 = vpop.f32.mrf.mxu3 }
 0x1cb   : > { %v1008_v20 = vadd.f32 %v969_v18, %v624_v15  ;;  %v1020_v21 = vadd.f32 %v999_v19, %v654_v14  ;;  %v647_v18 = vadd.f32 %v2939_v10, %v646_v13  ;;  %v648_v19 = vpop.f32.mrf.mxu0 }
 0x1cd   : > { %v1059_v24 = vmax.f32 %v1008_v20, 0.0  ;;  %v1071_v25 = vmax.f32 %v1020_v21, 0.0  ;;  %v649_v20 = vadd.f32 %v2939_v10, %v648_v19 }
 0x1cf   : > { %v2268_v26 = vpack.c.bf16 %v1059_v24, %v1058_v22  ;;  %v2298_v27 = vpack.c.bf16 %v1071_v25, %v1070_v23 }
 0x1d1   : > { %2269 = vst [vmem:[#allocation2 + $0x30] sm:$0xff] %v2268_v26  }
 0x1d2   : > { %2310 = vst [vmem:[#allocation2 + $0x28] sm:$0xff] %v2298_v27   ;;  %v972_v28 = vpop.f32.mrf.mxu2  ;;  %v1002_v30 = vpop.f32.mrf.mxu3 }
 0x1d3   : > { %v1009_v37 = vadd.f32 %v972_v28, %v627_v31  ;;  %v1021_v38 = vadd.f32 %v1002_v30, %v657_v32 }
 0x1d5   : > { %v1060_v44 = vmax.f32 %v1009_v37, 0.0  ;;  %v1072_v45 = vmax.f32 %v1021_v38, 0.0 }
 0x1da   : > { %v974_v40 = vpop.f32.mrf.mxu2  ;;  %v1004_v41 = vpop.f32.mrf.mxu3 }
 0x1db   : > { %v1010_v42 = vadd.f32 %v974_v40, %v629_v35  ;;  %v1022_v43 = vadd.f32 %v1004_v41, %v659_v34 }
 0x1dd   : > { %v1061_v46 = vmax.f32 %v1010_v42, 0.0  ;;  %v1073_v47 = vmax.f32 %v1022_v43, 0.0 }
 0x1df   : > { %v2273_v48 = vpack.c.bf16 %v1061_v46, %v1060_v44  ;;  %v2303_v49 = vpack.c.bf16 %v1073_v47, %v1072_v45 }
 0x1e1   : > { %2305 = vst [vmem:[#allocation2] sm:$0xff] %v2273_v48  }
 0x1e2   : > { %2311 = vst [vmem:[#allocation2 + $0x38] sm:$0xff] %v2303_v49   ;;  %v977_v33 = vpop.f32.mrf.mxu2 }
 0x1e3   : > { %v1011_v52 = vadd.f32 %v977_v33, %v632_v36 }
 0x1e5   : > { %v1062_v55 = vmax.f32 %v1011_v52, 0.0 }
 0x1ea   : > { %v979_v53 = vpop.f32.mrf.mxu2 }
 0x1eb   : > { %v1012_v54 = vadd.f32 %v979_v53, %v634_v51 }
 0x1ed   : > { %v1063_v56 = vmax.f32 %v1012_v54, 0.0 }
 0x1ef   : > { %v2278_v58 = vpack.c.bf16 %v1063_v56, %v1062_v55 }
 0x1f1   : > { %2306 = vst [vmem:[#allocation2 + $0x18] sm:$0xff] %v2278_v58  }
 0x1f2   : > { %v982_v59 = vpop.f32.mrf.mxu2 }
 0x1f3   : > { %v1013_v63 = vadd.f32 %v982_v59, %v637_v60 }
 0x1f5   : > { %v1064_v2 = vmax.f32 %v1013_v63, 0.0 }
 0x1fa   : > { %v984_v0 = vpop.f32.mrf.mxu2 }
 0x1fb   : > { %v1014_v1 = vadd.f32 %v984_v0, %v639_v62 }
 0x1fd   : > { %v1065_v3 = vmax.f32 %v1014_v1, 0.0 }
 0x1ff   : > { %v2283_v4 = vpack.c.bf16 %v1065_v3, %v1064_v2 }
 0x201   : > { %2307 = vst [vmem:[#allocation2 + $0x10] sm:$0xff] %v2283_v4  }
 0x202   : > { %v987_v6 = vpop.f32.mrf.mxu2 }
 0x203   : > { %v1015_v9 = vadd.f32 %v987_v6, %v642_v7 }
 0x205   : > { %v1066_v14 = vmax.f32 %v1015_v9, 0.0 }
 0x20a   : > { %v989_v11 = vpop.f32.mrf.mxu2 }
 0x20b   : > { %v1016_v12 = vadd.f32 %v989_v11, %v644_v8 }
 0x20d   : > { %v1067_v15 = vmax.f32 %v1016_v12, 0.0 }
 0x20f   : > { %v2288_v16 = vpack.c.bf16 %v1067_v15, %v1066_v14 }
 0x211   : > { %2308 = vst [vmem:[#allocation2 + $0x8] sm:$0xff] %v2288_v16  }
 0x212   : > { %v992_v17 = vpop.f32.mrf.mxu2 }
 0x213   : > { %v1017_v21 = vadd.f32 %v992_v17, %v647_v18 }
 0x215   : > { %v1068_v24 = vmax.f32 %v1017_v21, 0.0 }
 0x21a   : > { %v994_v22 = vpop.f32.mrf.mxu2 }
 0x21b   : > { %v1018_v23 = vadd.f32 %v994_v22, %v649_v20 }
 0x21d   : > { %v1069_v25 = vmax.f32 %v1018_v23, 0.0 }
 0x21f   : > { %v2293_v26 = vpack.c.bf16 %v1069_v25, %v1068_v24 }
 0x221   : > { %2309 = vst [vmem:[#allocation2 + $0x20] sm:$0xff] %v2293_v26  }
 0x222 PF: > { %p2020_p8 = scmp.ne.s32.totalorder %s2741_s30, 1 }
 0x224   : > { %1113 = sbr.rel (%p2020_p8) target bundleno = 1048 (0x418), region = 100 }
 0x229   : > { %v2240_v27 = vld [vmem:[#allocation16 + $0x38] sm:$0xff]  ;;  %v2239_v28 = vld [vmem:[#allocation16 + $0x30] sm:$0xff]  ;;  %v2238_v10 = vld [vmem:[#allocation16 + $0x28] sm:$0xff] }
 0x22a   : > { %v2256_v29 = vld [vmem:[#allocation14 + $0x38] sm:$0xff]  ;;  %2336 = vmatpush.bf16.msra.mxu3 %v2240_v27  ;;  %v2255_v30 = vld [vmem:[#allocation14 + $0x30] sm:$0xff]  ;;  %1254 = vmatpush.bf16.msra.mxu0 %v2240_v27  ;;  %v2254_v31 = vld [vmem:[#allocation14 + $0x28] sm:$0xff] }
 0x22b   : > { %1451 = vmatpush.bf16.msra.mxu1 %v2256_v29  ;;  %v2237_v32 = vld [vmem:[#allocation16 + $0x20] sm:$0xff]  ;;  %v2236_v35 = vld [vmem:[#allocation16 + $0x18] sm:$0xff]  ;;  %v2235_v38 = vld [vmem:[#allocation16 + $0x10] sm:$0xff] }
 0x22c   : > { %v2253_v34 = vld [vmem:[#allocation14 + $0x20] sm:$0xff]  ;;  %v2252_v37 = vld [vmem:[#allocation14 + $0x18] sm:$0xff]  ;;  %v2251_v39 = vld [vmem:[#allocation14 + $0x10] sm:$0xff] }
 0x22d   : > { %v2234_v40 = vld [vmem:[#allocation16 + $0x8] sm:$0xff]  ;;  %v2233_v42 = vld [vmem:[#allocation16] sm:$0xff]  ;;  %v2241_v45 = vld [vmem:[#allocation2 + $0x30] sm:$0xff] }
 0x22e   : > { %2337 = vmatpush.bf16.msra.mxu3 %v2239_v28  ;;  %1255 = vmatpush.bf16.msra.mxu0 %v2239_v28  ;;  %v2250_v41 = vld [vmem:[#allocation14 + $0x8] sm:$0xff]  ;;  %v2249_v43 = vld [vmem:[#allocation14] sm:$0xff]  ;;  %v2232_v46 = vld [vmem:[#allocation2 + $0x38] sm:$0xff] }
 0x22f   : > { %1452 = vmatpush.bf16.msra.mxu1 %v2255_v30  ;;  %v2231_v44 = vld [vmem:[#allocation2 + $0x28] sm:$0xff]  ;;  %v2242_v47 = vld [vmem:[#allocation2] sm:$0xff]  ;;  %v2243_v48 = vld [vmem:[#allocation2 + $0x18] sm:$0xff] }
 0x230   : > { %v2247_v49 = vld [vmem:[#allocation2 + $0x28] sm:$0xff]  ;;  %v2244_v33 = vld [vmem:[#allocation2 + $0x10] sm:$0xff]  ;;  %v2248_v50 = vld [vmem:[#allocation2 + $0x38] sm:$0xff] }
 0x231   : > { %v2245_v36 = vld [vmem:[#allocation2 + $0x8] sm:$0xff]  ;;  %v2246_v51 = vld [vmem:[#allocation2 + $0x20] sm:$0xff]  ;;  %v2225_v11 = vld [vmem:[#allocation2 + $0x30] sm:$0xff] }
 0x232   : > { %2338 = vmatpush.bf16.msra.mxu3 %v2238_v10  ;;  %1256 = vmatpush.bf16.msra.mxu0 %v2238_v10  ;;  %v2226_v15 = vld [vmem:[#allocation2] sm:$0xff]  ;;  %v2227_v19 = vld [vmem:[#allocation2 + $0x18] sm:$0xff]  ;;  %v2263_v21 = vld [vmem:[#allocation5 + $0x30] sm:$0xff] }
 0x233   : > { %1453 = vmatpush.bf16.msra.mxu1 %v2254_v31  ;;  %v2257_v20 = vld [vmem:[#allocation5] sm:$0xff]  ;;  %v2228_v22 = vld [vmem:[#allocation2 + $0x10] sm:$0xff]  ;;  %v2258_v23 = vld [vmem:[#allocation5 + $0x8] sm:$0xff] }
 0x234   : > { %v2264_v24 = vld [vmem:[#allocation5 + $0x38] sm:$0xff]  ;;  %v2229_v25 = vld [vmem:[#allocation2 + $0x8] sm:$0xff]  ;;  %v2259_v26 = vld [vmem:[#allocation5 + $0x10] sm:$0xff] }
 0x235   : > { %v2230_v27 = vld [vmem:[#allocation2 + $0x20] sm:$0xff] }
 0x236   : > { %2339 = vmatpush.bf16.msra.mxu3 %v2237_v32  ;;  %1257 = vmatpush.bf16.msra.mxu0 %v2237_v32  ;;  %v2261_v28 = vld [vmem:[#allocation5 + $0x20] sm:$0xff] }
 0x237   : > { %1454 = vmatpush.bf16.msra.mxu1 %v2253_v34 }
 0x23a   : > { %2340 = vmatpush.bf16.msra.mxu3 %v2236_v35  ;;  %1258 = vmatpush.bf16.msra.mxu0 %v2236_v35 }
 0x23b   : > { %1455 = vmatpush.bf16.msra.mxu1 %v2252_v37 }
 0x23e   : > { %2341 = vmatpush.bf16.msra.mxu3 %v2235_v38  ;;  %1259 = vmatpush.bf16.msra.mxu0 %v2235_v38 }
 0x23f   : > { %1456 = vmatpush.bf16.msra.mxu1 %v2251_v39 }
 0x242   : > { %2342 = vmatpush.bf16.msra.mxu3 %v2234_v40  ;;  %1260 = vmatpush.bf16.msra.mxu0 %v2234_v40 }
 0x243   : > { %1457 = vmatpush.bf16.msra.mxu1 %v2250_v41 }
 0x246   : > { %2343 = vmatpush.bf16.msra.mxu3 %v2233_v42  ;;  %1261 = vmatpush.bf16.msra.mxu0 %v2233_v42 }
 0x247   : > { %1458 = vmatpush.bf16.msra.mxu1 %v2249_v43 }
 0x249   : > { %1292 = vmatmul.bf16.vlgmr.msra.gmra.mxu3 %v2231_v44  ;;  %1262 = vmatmul.bf16.vlgmr.msra.gmra.mxu0 %v2225_v11 }
 0x24a   : > { %2344 = vmatpush.bf16.msrb.mxu3 %v2256_v29  ;;  %1459 = vmatmul.bf16.vlgmr.msra.gmra.mxu1 %v2241_v45  ;;  %v2260_v29 = vld [vmem:[#allocation5 + $0x18] sm:$0xff] }
 0x24e   : > { %2345 = vmatpush.bf16.msrb.mxu3 %v2255_v30  ;;  %v2262_v30 = vld [vmem:[#allocation5 + $0x28] sm:$0xff] }
 0x252   : > { %2346 = vmatpush.bf16.msrb.mxu3 %v2254_v31 }
 0x256   : > { %2347 = vmatpush.bf16.msrb.mxu3 %v2253_v34  ;;  %v2973_v34 = vld [vmem:[%s3017_s8] ss:$0 sm:$0xff] }
 0x259   : > { %1297 = vmatmul.bf16.gmra.mxu3 %v2232_v46  ;;  %1267 = vmatmul.bf16.gmra.mxu0 %v2226_v15 }
 0x25a   : > { %2348 = vmatpush.bf16.msrb.mxu3 %v2252_v37  ;;  %1464 = vmatmul.bf16.gmra.mxu1 %v2242_v47 }
 0x25e   : > { %2349 = vmatpush.bf16.msrb.mxu3 %v2251_v39 }
 0x262   : > { %2350 = vmatpush.bf16.msrb.mxu3 %v2250_v41 }
 0x266   : > { %2351 = vmatpush.bf16.msrb.mxu3 %v2249_v43 }
 0x269   : > { %1489 = vmatmul.bf16.vlgmr.msrb.gmra.mxu3 %v2247_v49  ;;  %1272 = vmatmul.bf16.gmra.mxu0 %v2227_v19 }
 0x26a   : > { %1469 = vmatmul.bf16.gmra.mxu1 %v2243_v48 }
 0x279   : > { %1494 = vmatmul.bf16.gmra.mxu3 %v2248_v50  ;;  %1277 = vmatmul.bf16.gmra.mxu0 %v2228_v22 }
 0x27a   : > { %1474 = vmatmul.bf16.gmra.mxu1 %v2244_v33 }
 0x289   : > { %1282 = vmatmul.bf16.gmra.mxu0 %v2229_v25 }
 0x28a   : > { %1479 = vmatmul.bf16.gmra.mxu1 %v2245_v36 }
 0x299   : > { %1287 = vmatmul.bf16.gmra.mxu0 %v2230_v27 }
 0x29a   : > { %1484 = vmatmul.bf16.gmra.mxu1 %v2246_v51 }
 0x2c6   : > { %v1263_v10 = vpop.f32.mrf.mxu0 }
 0x2c7   : > { %v1460_v52 = vpop.f32.mrf.mxu1  ;;  %v1264_v35 = vadd.f32 %v2973_v34, %v1263_v10 }
 0x2cc   : > { %v2962_v53 = vpop.f32.mrf.mxu3 }
 0x2cd   : > { %v1294_v37 = vadd.f32 %v2973_v34, %v2962_v53 }
 0x2ce   : > { %v1265_v31 = vpop.f32.mrf.mxu0 }
 0x2cf   : > { %v1462_v54 = vpop.f32.mrf.mxu1  ;;  %v1266_v44 = vadd.f32 %v2973_v34, %v1265_v31 }
 0x2d0   : > { %v1500_v55 = vpack.c.bf16 %v1462_v54, %v1460_v52 }
 0x2d4   : > { %v2964_v56 = vpop.f32.mrf.mxu3 }
 0x2d5   : > { %v1296_v43 = vadd.f32 %v2973_v34, %v2964_v56 }
 0x2d6   : > { %v1268_v32 = vpop.f32.mrf.mxu0 }
 0x2d7   : > { %v1465_v57 = vpop.f32.mrf.mxu1  ;;  %v1269_v49 = vadd.f32 %v2973_v34, %v1268_v32 }
 0x2dc   : > { %v2966_v58 = vpop.f32.mrf.mxu3 }
 0x2dd   : > { %v1299_v50 = vadd.f32 %v2973_v34, %v2966_v58 }
 0x2de   : > { %v1270_v42 = vpop.f32.mrf.mxu0 }
 0x2df   : > { %v1467_v59 = vpop.f32.mrf.mxu1 }
 0x2e0   : > { %v1501_v60 = vpack.c.bf16 %v1467_v59, %v1465_v57 }
 0x2e4   : > { %v2968_v61 = vpop.f32.mrf.mxu3 }
 0x2e5   : > { %v1301_v54 = vadd.f32 %v2973_v34, %v2968_v61 }
 0x2e6   : > { %v1273_v33 = vpop.f32.mrf.mxu0 }
 0x2e7   : > { %v1470_v62 = vpop.f32.mrf.mxu1  ;;  %v1274_v58 = vadd.f32 %v2973_v34, %v1273_v33 }
 0x2ec   : > { %v1490_v63 = vpop.f32.mrf.mxu3 }
 0x2ee   : > { %v1275_v56 = vpop.f32.mrf.mxu0 }
 0x2ef   : > { %v1472_v0 = vpop.f32.mrf.mxu1 }
 0x2f0   : > { %v1502_v18 = vpack.c.bf16 %v1472_v0, %v1470_v62 }
 0x2f4   : > { %v1492_v1 = vpop.f32.mrf.mxu3 }
 0x2f5   : > { %v1506_v8 = vpack.c.bf16 %v1492_v1, %v1490_v63 }
 0x2f6   : > { %v1278_v1 = vpop.f32.mrf.mxu0 }
 0x2f7   : > { %v1475_v2 = vpop.f32.mrf.mxu1 }
 0x2fc   : > { %v1495_v3 = vpop.f32.mrf.mxu3 }
 0x2fe   : > { %v1280_v61 = vpop.f32.mrf.mxu0 }
 0x2ff   : > { %v1477_v4 = vpop.f32.mrf.mxu1 }
 0x300   : > { %v1503_v17 = vpack.c.bf16 %v1477_v4, %v1475_v2  ;;  %v1276_v2 = vadd.f32 %v2973_v34, %v1275_v56 }
 0x304   : > { %v1497_v5 = vpop.f32.mrf.mxu3 }
 0x305   : > { %v1507_v6 = vpack.c.bf16 %v1497_v5, %v1495_v3  ;;  %v1279_v5 = vadd.f32 %v2973_v34, %v1278_v1 }
 0x307   : > { %v1480_v7 = vpop.f32.mrf.mxu1  ;;  %1588 = vmatpush.bf16.msra.mxu2 %v1507_v6  ;;  %2352 = vmatpush.bf16.msra.mxu3 %v1507_v6 }
 0x30b   : > { %1589 = vmatpush.bf16.msra.mxu2 %v1506_v8  ;;  %2353 = vmatpush.bf16.msra.mxu3 %v1506_v8  ;;  %v1283_v8 = vpop.f32.mrf.mxu0 }
 0x30f   : > { %v1482_v9 = vpop.f32.mrf.mxu1 }
 0x310   : > { %v1504_v16 = vpack.c.bf16 %v1482_v9, %v1480_v7  ;;  %v1281_v9 = vadd.f32 %v2973_v34, %v1280_v61 }
 0x317   : > { %v1485_v12 = vpop.f32.mrf.mxu1 }
 0x31f   : > { %v1487_v13 = vpop.f32.mrf.mxu1 }
 0x320   : > { %v1505_v14 = vpack.c.bf16 %v1487_v13, %v1485_v12  ;;  %v1284_v13 = vadd.f32 %v2973_v34, %v1283_v8 }
 0x322   : > { %1590 = vmatpush.bf16.msra.mxu2 %v1505_v14  ;;  %2354 = vmatpush.bf16.msra.mxu3 %v1505_v14  ;;  %v1285_v14 = vpop.f32.mrf.mxu0 }
 0x326   : > { %1591 = vmatpush.bf16.msra.mxu2 %v1504_v16  ;;  %2355 = vmatpush.bf16.msra.mxu3 %v1504_v16 }
 0x32a   : > { %1592 = vmatpush.bf16.msra.mxu2 %v1503_v17  ;;  %2356 = vmatpush.bf16.msra.mxu3 %v1503_v17  ;;  %v1286_v17 = vadd.f32 %v2973_v34, %v1285_v14 }
 0x32e   : > { %1593 = vmatpush.bf16.msra.mxu2 %v1502_v18  ;;  %2357 = vmatpush.bf16.msra.mxu3 %v1502_v18 }
 0x332   : > { %1594 = vmatpush.bf16.msra.mxu2 %v1501_v60  ;;  %2358 = vmatpush.bf16.msra.mxu3 %v1501_v60 }
 0x336   : > { %1595 = vmatpush.bf16.msra.mxu2 %v1500_v55  ;;  %2359 = vmatpush.bf16.msra.mxu3 %v1500_v55  ;;  %v1271_v55 = vadd.f32 %v2973_v34, %v1270_v42 }
 0x339   : > { %1596 = vmatmul.bf16.vlgmr.msra.gmra.mxu2 %v2257_v20  ;;  %1626 = vmatmul.bf16.vlgmr.msra.gmra.mxu3 %v2263_v21  ;;  %v1288_v20 = vpop.f32.mrf.mxu0 }
 0x33a   : > { %v1289_v21 = vadd.f32 %v2973_v34, %v1288_v20 }
 0x349   : > { %1601 = vmatmul.bf16.gmra.mxu2 %v2258_v23  ;;  %1631 = vmatmul.bf16.gmra.mxu3 %v2264_v24  ;;  %v1290_v24 = vpop.f32.mrf.mxu0 }
 0x34a   : > { %v1291_v25 = vadd.f32 %v2973_v34, %v1290_v24 }
 0x359   : > { %1606 = vmatmul.bf16.gmra.mxu2 %v2259_v26 }
 0x369   : > { %1611 = vmatmul.bf16.gmra.mxu2 %v2260_v29 }
 0x379   : > { %1616 = vmatmul.bf16.gmra.mxu2 %v2261_v28 }
 0x389   : > { %1621 = vmatmul.bf16.gmra.mxu2 %v2262_v30 }
 0x3bc   : > { %v1597_v38 = vpop.f32.mrf.mxu2  ;;  %v1627_v39 = vpop.f32.mrf.mxu3 }
 0x3bd   : > { %v1637_v40 = vadd.f32 %v1597_v38, %v1264_v35  ;;  %v1649_v41 = vadd.f32 %v1627_v39, %v1294_v37 }
 0x3bf   : > { %1688 = vst [vmem:[#allocation17] sm:$0xff] %v1637_v40 }
 0x3c0   : > { %1700 = vst [vmem:[#allocation17 + $0x60] sm:$0xff] %v1649_v41 }
 0x3c4   : > { %v1599_v45 = vpop.f32.mrf.mxu2  ;;  %v1629_v46 = vpop.f32.mrf.mxu3 }
 0x3c5   : > { %v1638_v47 = vadd.f32 %v1599_v45, %v1266_v44  ;;  %v1650_v48 = vadd.f32 %v1629_v46, %v1296_v43 }
 0x3c7   : > { %1689 = vst [vmem:[#allocation17 + $0x8] sm:$0xff] %v1638_v47 }
 0x3c8   : > { %1701 = vst [vmem:[#allocation17 + $0x68] sm:$0xff] %v1650_v48 }
 0x3cc   : > { %v1602_v36 = vpop.f32.mrf.mxu2  ;;  %v1632_v51 = vpop.f32.mrf.mxu3 }
 0x3cd   : > { %v1639_v52 = vadd.f32 %v1602_v36, %v1269_v49  ;;  %v1651_v53 = vadd.f32 %v1632_v51, %v1299_v50 }
 0x3cf   : > { %1690 = vst [vmem:[#allocation17 + $0x10] sm:$0xff] %v1639_v52 }
 0x3d0   : > { %1702 = vst [vmem:[#allocation17 + $0x70] sm:$0xff] %v1651_v53 }
 0x3d4   : > { %v1604_v57 = vpop.f32.mrf.mxu2  ;;  %v1634_v59 = vpop.f32.mrf.mxu3 }
 0x3d5   : > { %v1640_v60 = vadd.f32 %v1604_v57, %v1271_v55  ;;  %v1652_v62 = vadd.f32 %v1634_v59, %v1301_v54 }
 0x3d7   : > { %1691 = vst [vmem:[#allocation17 + $0x18] sm:$0xff] %v1640_v60 }
 0x3d8   : > { %1703 = vst [vmem:[#allocation17 + $0x78] sm:$0xff] %v1652_v62 }
 0x3dc   : > { %v1607_v63 = vpop.f32.mrf.mxu2 }
 0x3dd   : > { %v1641_v0 = vadd.f32 %v1607_v63, %v1274_v58 }
 0x3df   : > { %1692 = vst [vmem:[#allocation17 + $0x20] sm:$0xff] %v1641_v0 }
 0x3e4   : > { %v1609_v3 = vpop.f32.mrf.mxu2 }
 0x3e5   : > { %v1642_v4 = vadd.f32 %v1609_v3, %v1276_v2 }
 0x3e7   : > { %1693 = vst [vmem:[#allocation17 + $0x28] sm:$0xff] %v1642_v4 }
 0x3ec   : > { %v1612_v6 = vpop.f32.mrf.mxu2 }
 0x3ed   : > { %v1643_v7 = vadd.f32 %v1612_v6, %v1279_v5 }
 0x3ef   : > { %1694 = vst [vmem:[#allocation17 + $0x30] sm:$0xff] %v1643_v7 }
 0x3f4   : > { %v1614_v11 = vpop.f32.mrf.mxu2 }
 0x3f5   : > { %v1644_v12 = vadd.f32 %v1614_v11, %v1281_v9 }
 0x3f7   : > { %1695 = vst [vmem:[#allocation17 + $0x38] sm:$0xff] %v1644_v12 }
 0x3fc   : > { %v1617_v15 = vpop.f32.mrf.mxu2 }
 0x3fd   : > { %v1645_v16 = vadd.f32 %v1617_v15, %v1284_v13 }
 0x3ff   : > { %1696 = vst [vmem:[#allocation17 + $0x40] sm:$0xff] %v1645_v16 }
 0x404   : > { %v1619_v18 = vpop.f32.mrf.mxu2 }
 0x405   : > { %v1646_v19 = vadd.f32 %v1619_v18, %v1286_v17 }
 0x407   : > { %1697 = vst [vmem:[#allocation17 + $0x48] sm:$0xff] %v1646_v19 }
 0x40c   : > { %v1622_v22 = vpop.f32.mrf.mxu2 }
 0x40d   : > { %v1647_v23 = vadd.f32 %v1622_v22, %v1289_v21 }
 0x40f   : > { %1698 = vst [vmem:[#allocation17 + $0x50] sm:$0xff] %v1647_v23 }
 0x414   : > { %v1624_v26 = vpop.f32.mrf.mxu2 }
 0x415   : > { %v1648_v27 = vadd.f32 %v1624_v26, %v1291_v25 }
 0x417   : > { %1699 = vst [vmem:[#allocation17 + $0x58] sm:$0xff] %v1648_v27 }
 0x418 PF: > { %s3023_s23 = sadd.s32 4294967295, %s2749_s11   ;;  %s1714_s25 = sshll.u32 %s3018_s9, 4  ;;  %s1715_s25 = int_to_ptr.hbm [resolvable:$true] %s1714_s25 }
 0x419   : > { %p2428_p9 = scmp.eq.s32.totalorder %s3023_s23, 1  ;;  %s2761_s15 = smov [#allocation17]  }
 0x41a   : > { %s1712_s18 = sshll.u32 %s2761_s15, 4  ;;  %s2762_s21 = smov 128   ;;  %s1713_s18 = int_to_ptr.vmem [resolvable:$true] %s1712_s18 }
 0x41b   : > { %s2763_s24 = smov 8  }
 0x41c   : > { %2389 = dma.vmem_to_hbm [thread:$0]  (%p2428_p9), %s1713_s18, 2048, %s1715_s25, [#allocation7], %s2762_s21, %s2762_s21, %s2763_s24  }
 0x41d   : > { %2736 = dma.done.wait (%p2428_p9), [#allocation7], 2048  }
 0x41e   : > { %2738 = vsyncadd (%p2428_p9), [#allocation7], 4294965248 }
 0x41f PF: > { %s24_s11 = sadd.s32 1, %s2749_s11   ;;  %s3024_s30 = smov %s2745_s10 }
 0x420   : > { %p21_p10 = scmp.ge.s32.totalorder %s24_s11, 4   ;;  %s3025_s10 = smov %s3027_s19 }
 0x422   :  { %23 = sbr.rel (!%p21_p10) target bundleno = 6 (0x6), region = 140 }
 0x427   :  { %1731 = vsyncpa [#allocation6], 1 }
 0x428   :  { %1733 = vsyncpa [#allocation6 + $0x1], 1 }
 0x429   :  { %1734 = vsyncpa [#allocation9], 1 }
 0x42a   :  { %1735 = vsyncpa [#allocation12], 1 }
 0x42b   :  { %1736 = vsyncpa [#allocation15], 1 }
 0x42c   :  { %1737 = vsyncpa [#allocation7], 1 }
 0x42d   :  { %1739 = vsyncpa [#allocation7 + $0x1], 1 }

</bundles_post_ra>
